<compile_context>
chip_gen: v6e
topology: v6e:2x2x1
jax: 0.10.0
libtpu: 0.0.40
codegen_flags: <defaults>
</compile_context>

<pallas_src>
import math

import jax
import jax.numpy as jnp
from jax.experimental import pallas as pl
from jax.experimental.pallas import tpu as pltpu

_SQRT_2_OVER_PI = math.sqrt(2.0 / math.pi)
_K0 = _SQRT_2_OVER_PI                 # sqrt(2/pi)
_K1 = 0.044715 * _SQRT_2_OVER_PI      # 0.044715 * sqrt(2/pi)


def _gelu_kernel(x_ref, o_ref):
    # Compute in f32 regardless of storage dtype (free under the HBM-bound
    # roofline on all generations; v5e's VPU/EUP lack bf16 anyway).
    x = x_ref[...].astype(jnp.float32)
    # sqrt(2/pi) * (x + 0.044715 x^3) in Horner form: x * (_K0 + _K1 * x * x)
    z = x * (_K0 + _K1 * (x * x))
    # tanh == single EUP push per vreg; ~6 VPU ops/elem stay well under the
    # 4-VALU-slot budget, so the kernel remains purely HBM-bound, v7x included.
    y = 0.5 * x * (1.0 + jnp.tanh(z))
    o_ref[...] = y.astype(o_ref.dtype)


def _gelu_jnp(x):
    """Plain-XLA path for tiny inputs (fusable with neighbours)."""
    xf = x.astype(jnp.float32)
    y = 0.5 * xf * (1.0 + jnp.tanh(_SQRT_2_OVER_PI * (xf + 0.044715 * xf * xf * xf)))
    return y.astype(x.dtype)


def gelu_pallas(x, *, tile_bytes=2 * 1024 * 1024, min_pallas_bytes=256 * 1024,
                donate=False):
    """Tanh-GELU applied elementwise to x (any shape). HBM-bandwidth bound."""
    if x.size == 0:
        return x

    dtype = x.dtype
    itemsize = jnp.dtype(dtype).itemsize
    N = x.size

    # Small-input bypass: launch + per-step overhead dominates below a few
    # hundred KiB, and XLA can fuse the elementwise op with its producer.
    if N * itemsize < min_pallas_bytes:
        return _gelu_jnp(x)

    orig_shape = x.shape
    sub = max(8, 32 // itemsize)          # sublane packing: 8 f32 / 16 bf16 / 32 i8

    # --- Lane-dense layout: (R, C) with C a multiple of 128 -------------------
    C = None
    if N % 128 == 0:
        m = N // 128
        for k in range(min(m, 16), 0, -1):   # widest C <= 2048 dividing N
            if m % k == 0:
                C = 128 * k
                break
    flat = x.reshape(-1)
    if C is None:
        # N not a multiple of 128: pad the flat vector to a lane-dense slab and
        # slice the tail afterwards.  One cheap pad/slice pass beats running
        # every block with masked narrow-lane stores (~5x measured penalty).
        C = 512
        padded_n = pl.cdiv(N, C) * C
        flat = jnp.pad(flat, (0, padded_n - N))
    x2 = flat.reshape(-1, C)
    R = x2.shape[0]

    # --- Tile rows: byte-budgeted (f32-equivalent, since internal compute is
    # f32), sublane-aligned, capped at the full extent. ------------------------
    max_rows = max(sub, (tile_bytes // 4 // C) // sub * sub)
    tile_r = min(max_rows, R)
    # Guarantee >= 4 blocks (>= 2 per TensorCore on v7x) when the input is big
    # enough so both cores keep double-buffering; otherwise >= 2 for pipelining.
    for target in (4, 2):
        if pl.cdiv(R, tile_r) < target and R >= target * sub:
            tile_r = pl.cdiv(pl.cdiv(R, target), sub) * sub
            break

    grid = (pl.cdiv(R, tile_r),)   # partial last block handled by Pallas

    cost = pl.CostEstimate(
        flops=8 * N,
        transcendentals=N,
        bytes_accessed=2 * N * itemsize,
    )

    out = pl.pallas_call(
        _gelu_kernel,
        out_shape=jax.ShapeDtypeStruct(x2.shape, dtype),
        grid_spec=pltpu.PrefetchScalarGridSpec(
            num_scalar_prefetch=0,
            grid=grid,
            in_specs=[pl.BlockSpec((tile_r, C), lambda i: (i, 0))],
            out_specs=pl.BlockSpec((tile_r, C), lambda i: (i, 0)),
        ),
        compiler_params=pltpu.CompilerParams(
            dimension_semantics=("parallel",),
            vmem_limit_bytes=32 * 1024 * 1024,   # safe on v5e/v6e/v7x
        ),
        cost_estimate=cost,
        input_output_aliases={0: 0} if donate else {},
    )(x2)

    if out.size != N:
        out = out.reshape(-1)[:N]
    return out.reshape(orig_shape)


if __name__ == "__main__":
    key = jax.random.PRNGKey(0)
    k0, k1, k2, k3 = jax.random.split(key, 4)

    def ref(x):
        xf = x.astype(jnp.float32)
        return 0.5 * xf * (1.0 + jnp.tanh(
            math.sqrt(2.0 / math.pi) * (xf + 0.044715 * jnp.power(xf, 3))))

    # 1) GPT-2 style activation (batch=2, seq=8, hidden=32), forced Pallas path.
    x = jax.random.normal(k0, (2, 8, 32), dtype=jnp.float32)
    y = gelu_pallas(x, min_pallas_bytes=0)
    jax.block_until_ready(y)
    assert y.shape == x.shape and y.dtype == x.dtype
    assert jnp.allclose(y, ref(x), atol=2e-5, rtol=2e-5), "f32 primary mismatch"

    # 2) Default small-input bypass on the same values.
    y_bypass = gelu_pallas(x)
    jax.block_until_ready(y_bypass)
    assert jnp.allclose(y_bypass, ref(x), atol=2e-5, rtol=2e-5), "bypass mismatch"

    # 3) N not a multiple of 128: padded lane-dense slab + tail slice.
    x_pad = jax.random.normal(k1, (17, 8, 24), dtype=jnp.float32)
    y_pad = gelu_pallas(x_pad, min_pallas_bytes=0)
    jax.block_until_ready(y_pad)
    assert jnp.allclose(y_pad, ref(x_pad), atol=2e-5, rtol=2e-5), "padded-path mismatch"

    # 4) bf16 storage with f32 internal compute; 2-block grid.
    x_bf = jax.random.normal(k2, (2, 128, 256), dtype=jnp.bfloat16)
    y_bf = gelu_pallas(x_bf, min_pallas_bytes=0)
    jax.block_until_ready(y_bf)
    assert y_bf.dtype == jnp.bfloat16
    assert jnp.allclose(y_bf.astype(jnp.float32), ref(x_bf),
                        atol=2e-2, rtol=2e-2), "bf16 mismatch"

    # 5) Larger f32 slab: >= 4 parallel blocks (>= 2 per TensorCore on v7x).
    x_big = jax.random.normal(k3, (8, 256, 512), dtype=jnp.float32)
    y_big = gelu_pallas(x_big)
    jax.block_until_ready(y_big)
    assert jnp.allclose(y_big, ref(x_big), atol=2e-5, rtol=2e-5), "multi-block mismatch"

    print("KERNEL_OK")
</pallas_src>

<mosaic_0001>
module attributes {stable_mosaic.version = 11 : i64} {
  func.func @_gelu_kernel(%arg0: i32, %arg1: memref<1x512xf32, #tpu.memory_space<vmem>>, %arg2: memref<1x512xf32, #tpu.memory_space<vmem>>) attributes {dimension_semantics = [#tpu.dimension_semantics<parallel>], iteration_bounds = array<i64: 1>, scalar_prefetch = 0 : i64, scratch_operands = 0 : i64, tpu.core_type = #tpu.core_type<tc>, window_params = [{transform_indices = @transform_0, window_bounds = array<i64: 1, 512>}, {transform_indices = @transform_1, window_bounds = array<i64: 1, 512>}]} {
    %c0 = arith.constant 0 : index
    %c0_0 = arith.constant 0 : index
    %0 = vector.load %arg1[%c0, %c0_0] : memref<1x512xf32, #tpu.memory_space<vmem>>, vector<1x512xf32>
    %1 = arith.mulf %0, %0 : vector<1x512xf32>
    %cst = arith.constant 0.0356774069 : f32
    %2 = vector.broadcast %cst : f32 to vector<1x512xf32>
    %3 = arith.mulf %2, %1 : vector<1x512xf32>
    %cst_1 = arith.constant 0.797884583 : f32
    %4 = vector.broadcast %cst_1 : f32 to vector<1x512xf32>
    %5 = arith.addf %4, %3 : vector<1x512xf32>
    %6 = arith.mulf %0, %5 : vector<1x512xf32>
    %cst_2 = arith.constant 5.000000e-01 : f32
    %7 = vector.broadcast %cst_2 : f32 to vector<1x512xf32>
    %8 = arith.mulf %7, %0 : vector<1x512xf32>
    %9 = math.tanh %6 : vector<1x512xf32>
    %cst_3 = arith.constant 1.000000e+00 : f32
    %10 = vector.broadcast %cst_3 : f32 to vector<1x512xf32>
    %11 = arith.addf %10, %9 : vector<1x512xf32>
    %12 = arith.mulf %8, %11 : vector<1x512xf32>
    %c0_4 = arith.constant 0 : index
    %c0_5 = arith.constant 0 : index
    %13 = vector.load %arg2[%c0_4, %c0_5] : memref<1x512xf32, #tpu.memory_space<vmem>>, vector<1x512xf32>
    tpu.vector_store %arg2[%c0_4, %c0_5], %12 {strides = array<i32>} : memref<1x512xf32, #tpu.memory_space<vmem>>, vector<1x512xf32>,
    return
  }
  func.func @transform_0(%arg0: i32) -> (i32, i32) {
    %c0_i32 = arith.constant 0 : i32
    %c0_i32_0 = arith.constant 0 : i32
    return %arg0, %c0_i32 : i32, i32
  }
  func.func @transform_1(%arg0: i32) -> (i32, i32) {
    %c0_i32 = arith.constant 0 : i32
    %c0_i32_0 = arith.constant 0 : i32
    return %arg0, %c0_i32 : i32, i32
  }
}

</mosaic_0001>

<bundles_post_ra>
// kernel: tpu_custom_call.1
= control target key start
LH: loop header
LB: loop body
LE: loop exit
PB: predicated region body
PF: predicated region fallthrough
CT: control target
= control target key end

     0   :  { %6 = vsyncpa [#allocation3], 0  ;;  %s116_s0 = inlined_call_operand.hbm [shape: f32[1,512], index: 0, kind: input, shape index: {}]   ;;  %s117_s1 = inlined_call_operand.hbm [shape: f32[1,512], index: 1, kind: output, shape index: {}]  }
   0x1   :  { %7 = vsyncpa [#allocation4], 0  ;;  %s98_s6 = smov [#allocation2]  }
   0x2   :  { %s14_s7 = sshll.u32 %s98_s6, 4  ;;  %s15_s7 = int_to_ptr.vmem [resolvable:$true] %s14_s7 }
   0x3   :  { %s62_s8 = scalar_lea.vmem %s15_s7, 64  ;;  %p67_p1 = scmp.lt.s32.totalorder %s15_s7, %s15_s7 }
   0x4   :  { %p63_p0 = scmp.ne.s32.totalorder %s15_s7, %s62_s8  ;;  %p68_p2 = scmp.lt.s32.totalorder %s62_s8, %s62_s8 }
   0x6   :  { %p69_p3 = por %p68_p2, %p67_p1 }
   0x8   :  { %p70_p4 = pnand %p69_p3, %p63_p0 }
   0xa   :  { %73 = shalt.err (!%p70_p4)
}
   0xb   :  { %17 = dma.hbm_to_vmem [thread:$0]  %s116_s0, 64, %s15_s7, [#allocation3]  }
   0xc   :  { %94 = dma.done.wait [#allocation3], 64  }
   0xd   :  { %95 = vsyncadd [#allocation3], 4294967232  ;;  %v21_v0 = vld [vmem:[#allocation2] sm:$0xf]  ;;  %v30_v5 = vlaneseq  ;;  %s99_s11 = smov [#allocation5]  }
   0xe   :  { %v22_v1 = vmul.f32 %v21_v0, %v21_v0  ;;  %v26_v6 = vmul.f32 0.5, %v21_v0  ;;  %s41_s12 = sshll.u32 %s99_s11, 4  ;;  %s42_s12 = int_to_ptr.vmem [resolvable:$true] %s41_s12 }
   0xf   :  { %vm32_vm0 = vcmp.lt.s32.totalorder %v30_v5, 512  ;;  %s74_s13 = scalar_lea.vmem %s42_s12, 64  ;;  %p79_p6 = scmp.lt.s32.totalorder %s42_s12, %s42_s12 }
  0x10   :  { %v23_v2 = vmul.f32 0.035677407, %v22_v1  ;;  %p75_p5 = scmp.ne.s32.totalorder %s42_s12, %s74_s13  ;;  %p80_p7 = scmp.lt.s32.totalorder %s74_s13, %s74_s13 }
  0x12   :  { %v24_v3 = vadd.f32 0.7978846, %v23_v2  ;;  %p81_p8 = por %p80_p7, %p79_p6 }
  0x14   :  { %v25_v4 = vmul.f32 %v24_v3, %v21_v0  ;;  %p82_p9 = pnand %p81_p8, %p75_p5 }
  0x16   :  { %52 = vtanh.f32 %v25_v4 }
  0x23   :  { %v53_v7 = vpop.eup %52 }
  0x24   :  { %v28_v8 = vadd.f32 1.0, %v53_v7 }
  0x26   :  { %v29_v9 = vmul.f32 %v28_v8, %v26_v6 }
  0x28   :  { %34 = vst.msk [vmem:[#allocation5] sm:$0xf] %vm32_vm0, %v29_v9 }
  0x29   :  { %85 = shalt.err (!%p82_p9)
}
  0x2a   :  { %44 = dma.vmem_to_hbm [thread:$0]  %s42_s12, 64, %s117_s1, [#allocation4]  }
  0x2b   :  { %96 = dma.done.wait [#allocation4], 64  }
  0x2c   :  { %97 = vsyncadd [#allocation4], 4294967232 }
  0x2d   :  { %48 = vsyncpa [#allocation3], 1 }
  0x2e   :  { %49 = vsyncpa [#allocation4], 1 }

</bundles_post_ra>
